<compile_context>
chip_gen: v7x
topology: tpu7x:2x2x1
jax: 0.10.0
libtpu: 0.0.40
codegen_flags: <defaults>
</compile_context>

<pallas_src>
import functools

import jax
import jax.numpy as jnp
from jax.experimental import pallas as pl

_BF16 = jnp.bfloat16
LANES = 128
_LAYER_NAMES = ("ggn", "ggn2", "ggn3", "tr2", "dec1", "dec2", "dec3", "dec4")


def _round_up(x, m):
    return ((x + m - 1) // m) * m


def _layer_defs(in_ch, out1, out2, out3, deco2, deco3, deco4, latent=64):
    # (kind, f_in, f_out, activation) for every layer, in forward order.
    return (
        ("sage", in_ch, out1, "tanh"),          # ggn
        ("sage", out1, out2, "tanh"),           # ggn2
        ("sage", out2, out3, "tanh"),           # ggn3
        ("lin", out3, latent, None),            # tr2 -> mu (logvar ties to it)
        ("lin", latent, deco2, "leaky_relu"),   # dec1
        ("sage", deco2, deco3, "leaky_relu"),   # dec2
        ("sage", deco3, deco4, "tanh"),         # dec3
        ("sage", deco4, 3, None),               # dec4 -> z2
    )


def _weight_layout(layers):
    """Sublane row offset of each layer's weight block in the packed slab."""
    rows, row = [], 0
    for _, fi, _, _ in layers:
        rows.append(row)
        row += _round_up(fi, 8)          # keep every block 8-sublane aligned
    return tuple(rows), _round_up(row, 8)


def _act(x, kind):
    if kind == "tanh":
        return jnp.tanh(x)
    if kind == "leaky_relu":
        return jnp.where(x >= 0, x, 0.01 * x)   # F.leaky_relu default slope
    return x


# ----------------------------------------------------------------------------
# Fused forward kernel: entire GCN_Message.forward in one pallas_call.
# ----------------------------------------------------------------------------
def _fused_forward_kernel(data_ref, w_ref, b_ref, o_ref, *,
                          layers, layout, n, in_ch, latent):
    a_bf = data_ref[:, :n]                                 # bf16 [N, N]
    h = data_ref[:, n:n + in_ch].astype(jnp.float32)       # f32  [N, in_ch]

    mu = None
    for li, (kind, fi, fo, act) in enumerate(layers):
        row = layout[li]
        wcols = 2 * fo if kind == "sage" else fo
        w = w_ref[row:row + fi, :wcols]                    # bf16 [fi, wcols]
        b = b_ref[li:li + 1, :fo]                          # f32  [1, fo]

        # One MXU push for both lin_l and lin_r: XW = X @ [Wl | Wr].
        xw = jnp.dot(h.astype(_BF16), w, preferred_element_type=jnp.float32)
        if kind == "sage":
            agg = jnp.dot(a_bf, xw[:, :fo].astype(_BF16),
                          preferred_element_type=jnp.float32)
            out = agg + xw[:, fo:] + b
        else:
            out = xw + b
        h = _act(out, act)

        if li == 3:
            # tr2 output: mu (== logvar in the reference).  Eval-mode
            # reparametrize is z = mu, so the decoder just keeps running on h.
            # TODO(synk): training-mode mu + randn * exp(logvar) noise omitted.
            mu = h
        # TODO(synk): F.dropout after each activation treated as identity (eval).

    z2 = h                                                 # [N, 3]
    pad = jnp.zeros((n, LANES - latent - 3), jnp.float32)
    # Single lane-dense unmasked store: [ mu | z2 | zeros ].
    o_ref[...] = jnp.concatenate([mu, z2, pad], axis=-1)


# ----------------------------------------------------------------------------
# One-time parameter packing (hoisted out of the per-call path).
# ----------------------------------------------------------------------------
def pack_params(params, layers):
    rows, total_rows = _weight_layout(layers)
    wslab = jnp.zeros((total_rows, LANES), _BF16)
    bslab = jnp.zeros((_round_up(len(layers), 8), LANES), jnp.float32)
    for li, (name, (kind, fi, fo, _)) in enumerate(zip(_LAYER_NAMES, layers)):
        if kind == "sage":
            wl, wr, b = params[name]
            w = jnp.concatenate([wl, wr], axis=1)          # [fi, 2*fo]: agg|root
        else:
            w, b = params[name]
        wslab = wslab.at[rows[li]:rows[li] + fi, :w.shape[1]].set(w.astype(_BF16))
        bslab = bslab.at[li, :fo].set(jnp.reshape(b, (-1,)).astype(jnp.float32))
    return wslab, bslab


# ----------------------------------------------------------------------------
# Jitted forward wrapper: one pallas_call, everything VMEM-resident.
# ----------------------------------------------------------------------------
@functools.partial(jax.jit, static_argnames=("layers",))
def gcn_message_forward(wslab, bslab, x, a_mean, layers):
    n, in_ch = x.shape
    latent = layers[3][2]
    assert n + in_ch <= LANES, "data-slab packing assumes N + in_channels <= 128"
    rows, _ = _weight_layout(layers)

    # Lane-dense input slab: [ A_mean (N) | x (in_ch) | zeros ].
    data = jnp.zeros((n, LANES), _BF16)
    data = data.at[:, :n].set(a_mean.astype(_BF16))
    data = data.at[:, n:n + in_ch].set(x.astype(_BF16))

    kernel = functools.partial(
        _fused_forward_kernel,
        layers=layers, layout=rows, n=n, in_ch=in_ch, latent=latent)

    out = pl.pallas_call(
        kernel,
        out_shape=jax.ShapeDtypeStruct((n, LANES), jnp.float32),
    )(data, wslab, bslab)

    mu = out[:, :latent]
    logvar = mu                          # reference returns tr2(hidden1) twice
    xy = out[:, latent:latent + 2]       # z2[:, [0, 1]]
    angle = out[:, latent + 2]           # z2[:, 2]
    return xy, angle, mu, logvar


# ----------------------------------------------------------------------------
# Parameters, graph preprocessing, pure-f32 reference for validation.
# ----------------------------------------------------------------------------
def make_params(key, in_channels, out1, out2, out3, deco2, deco3, deco4):
    def nxt():
        nonlocal key
        key, sub = jax.random.split(key)
        return sub

    def lin_p(fi, fo):
        w = 0.1 * jax.random.normal(nxt(), (fi, fo), jnp.float32)
        b = 0.1 * jax.random.normal(nxt(), (1, fo), jnp.float32)
        return w, b

    def sage_p(fi, fo):
        w_l, b = lin_p(fi, fo)                                      # lin_l (+bias)
        w_r = 0.1 * jax.random.normal(nxt(), (fi, fo), jnp.float32)  # lin_r
        return w_l, w_r, b

    return {
        "ggn": sage_p(in_channels, out1),
        "ggn2": sage_p(out1, out2),
        "ggn3": sage_p(out2, out3),
        "tr2": lin_p(out3, 64),
        "dec1": lin_p(64, deco2),
        "dec2": sage_p(deco2, deco3),
        "dec3": sage_p(deco3, deco4),
        "dec4": sage_p(deco4, 3),
    }


def dense_mean_adj(edge_index, num_nodes):
    """Mean-aggregation dense adjacency (edge multiplicity respected, as PyG)."""
    src, dst = edge_index[0], edge_index[1]
    a = jnp.zeros((num_nodes, num_nodes), jnp.float32).at[dst, src].add(1.0)
    deg = a.sum(axis=1, keepdims=True)
    return a / jnp.where(deg > 0, deg, 1.0)


def _reference_forward(params, x, a_mean):
    """Pure-JAX f32 reference (eval-mode) for numerical validation."""
    def sage(name, h):
        wl, wr, b = params[name]
        return (a_mean @ h) @ wl + h @ wr + b

    def lrelu(v):
        return jnp.where(v >= 0, v, 0.01 * v)

    h = jnp.tanh(sage("ggn", x))
    h = jnp.tanh(sage("ggn2", h))
    h = jnp.tanh(sage("ggn3", h))
    mu = h @ params["tr2"][0] + params["tr2"][1]
    out = lrelu(mu @ params["dec1"][0] + params["dec1"][1])
    out = lrelu(sage("dec2", out))
    out = jnp.tanh(sage("dec3", out))
    z2 = sage("dec4", out)
    return z2[:, :2], z2[:, 2], mu, mu


# ----------------------------------------------------------------------------
if __name__ == "__main__":
    N = 16          # number of graph nodes
    IN_CH = 4       # in_channels
    OUT1, OUT2, OUT3 = 16, 16, 16
    DECO2, DECO3, DECO4 = 32, 16, 8

    key = jax.random.PRNGKey(0)
    k_x, k_e, k_p = jax.random.split(key, 3)

    x = jax.random.normal(k_x, (N, IN_CH), jnp.float32)

    # Deterministic random edge list (2, E): src row 0, dst row 1.
    E = 48
    edge_index = jax.random.randint(k_e, (2, E), 0, N, dtype=jnp.int32)
    a_mean = dense_mean_adj(edge_index, N)

    layers = _layer_defs(IN_CH, OUT1, OUT2, OUT3, DECO2, DECO3, DECO4)
    params = make_params(k_p, IN_CH, OUT1, OUT2, OUT3, DECO2, DECO3, DECO4)
    wslab, bslab = pack_params(params, layers)   # one-time bf16 pack/cast

    xy, angle, mu, logvar = jax.block_until_ready(
        gcn_message_forward(wslab, bslab, x, a_mean, layers))

    assert xy.shape == (N, 2)
    assert angle.shape == (N,)
    assert mu.shape == (N, 64)
    assert logvar.shape == (N, 64)

    # Validate the fused bf16-MXU kernel against the pure-f32 JAX reference.
    rxy, rang, rmu, _ = _reference_forward(params, x, a_mean)
    for got, ref in ((xy, rxy), (angle, rang), (mu, rmu)):
        assert bool(jnp.all(jnp.isfinite(got)))
        assert float(jnp.max(jnp.abs(got - jnp.asarray(ref)))) < 1e-1

    print("KERNEL_OK")
</pallas_src>

<mosaic_0001>
module attributes {stable_mosaic.version = 11 : i64} {
  func.func @_fused_forward_kernel(%arg0: memref<16x128xbf16, #tpu.memory_space<vmem>>, %arg1: memref<176x128xbf16, #tpu.memory_space<vmem>>, %arg2: memref<8x128xf32, #tpu.memory_space<vmem>>, %arg3: memref<16x128xf32, #tpu.memory_space<vmem>>) attributes {dimension_semantics = [], scalar_prefetch = 0 : i64, scratch_operands = 0 : i64, tpu.core_type = #tpu.core_type<tc>} {
    %c0 = arith.constant 0 : index
    %c0_0 = arith.constant 0 : index
    %0 = vector.load %arg0[%c0, %c0_0] : memref<16x128xbf16, #tpu.memory_space<vmem>>, vector<16x16xbf16>
    %c0_1 = arith.constant 0 : index
    %c16 = arith.constant 16 : index
    %1 = vector.load %arg0[%c0_1, %c16] : memref<16x128xbf16, #tpu.memory_space<vmem>>, vector<16x4xbf16>
    %2 = arith.extf %1 : vector<16x4xbf16> to vector<16x4xf32>
    %c0_2 = arith.constant 0 : index
    %c0_3 = arith.constant 0 : index
    %3 = vector.load %arg1[%c0_2, %c0_3] : memref<176x128xbf16, #tpu.memory_space<vmem>>, vector<4x32xbf16>
    %c0_4 = arith.constant 0 : index
    %c0_5 = arith.constant 0 : index
    %4 = vector.load %arg2[%c0_4, %c0_5] : memref<8x128xf32, #tpu.memory_space<vmem>>, vector<1x16xf32>
    %5 = arith.truncf %2 : vector<16x4xf32> to vector<16x4xbf16>
    %cst = arith.constant dense<0.000000e+00> : vector<16x32xf32>
    %6 = tpu.matmul %5, %3, %cst {dimension_numbers = #tpu.dot_dimension_numbers<[1], [0], [0], [1], [0, 0, 1, 1], [], []>} : vector<16x4xbf16>, vector<4x32xbf16>, vector<16x32xf32> -> vector<16x32xf32>
    %7 = vector.extract_strided_slice %6 {offsets = [0, 0], sizes = [16, 16], strides = [1, 1]} : vector<16x32xf32> to vector<16x16xf32>
    %8 = arith.truncf %7 : vector<16x16xf32> to vector<16x16xbf16>
    %cst_6 = arith.constant dense<0.000000e+00> : vector<16x16xf32>
    %9 = tpu.matmul %0, %8, %cst_6 {dimension_numbers = #tpu.dot_dimension_numbers<[1], [0], [0], [1], [0, 0, 1, 1], [], []>} : vector<16x16xbf16>, vector<16x16xbf16>, vector<16x16xf32> -> vector<16x16xf32>
    %10 = vector.extract_strided_slice %6 {offsets = [0, 16], sizes = [16, 16], strides = [1, 1]} : vector<16x32xf32> to vector<16x16xf32>
    %11 = arith.addf %9, %10 : vector<16x16xf32>
    %12 = vector.broadcast %4 : vector<1x16xf32> to vector<16x16xf32>
    %13 = arith.addf %11, %12 : vector<16x16xf32>
    %14 = math.tanh %13 : vector<16x16xf32>
    %c8 = arith.constant 8 : index
    %c0_7 = arith.constant 0 : index
    %15 = vector.load %arg1[%c8, %c0_7] : memref<176x128xbf16, #tpu.memory_space<vmem>>, vector<16x32xbf16>
    %c1 = arith.constant 1 : index
    %c0_8 = arith.constant 0 : index
    %16 = vector.load %arg2[%c1, %c0_8] : memref<8x128xf32, #tpu.memory_space<vmem>>, vector<1x16xf32>
    %17 = arith.truncf %14 : vector<16x16xf32> to vector<16x16xbf16>
    %cst_9 = arith.constant dense<0.000000e+00> : vector<16x32xf32>
    %18 = tpu.matmul %17, %15, %cst_9 {dimension_numbers = #tpu.dot_dimension_numbers<[1], [0], [0], [1], [0, 0, 1, 1], [], []>} : vector<16x16xbf16>, vector<16x32xbf16>, vector<16x32xf32> -> vector<16x32xf32>
    %19 = vector.extract_strided_slice %18 {offsets = [0, 0], sizes = [16, 16], strides = [1, 1]} : vector<16x32xf32> to vector<16x16xf32>
    %20 = arith.truncf %19 : vector<16x16xf32> to vector<16x16xbf16>
    %cst_10 = arith.constant dense<0.000000e+00> : vector<16x16xf32>
    %21 = tpu.matmul %0, %20, %cst_10 {dimension_numbers = #tpu.dot_dimension_numbers<[1], [0], [0], [1], [0, 0, 1, 1], [], []>} : vector<16x16xbf16>, vector<16x16xbf16>, vector<16x16xf32> -> vector<16x16xf32>
    %22 = vector.extract_strided_slice %18 {offsets = [0, 16], sizes = [16, 16], strides = [1, 1]} : vector<16x32xf32> to vector<16x16xf32>
    %23 = arith.addf %21, %22 : vector<16x16xf32>
    %24 = vector.broadcast %16 : vector<1x16xf32> to vector<16x16xf32>
    %25 = arith.addf %23, %24 : vector<16x16xf32>
    %26 = math.tanh %25 : vector<16x16xf32>
    %c24 = arith.constant 24 : index
    %c0_11 = arith.constant 0 : index
    %27 = vector.load %arg1[%c24, %c0_11] : memref<176x128xbf16, #tpu.memory_space<vmem>>, vector<16x32xbf16>
    %c2 = arith.constant 2 : index
    %c0_12 = arith.constant 0 : index
    %28 = vector.load %arg2[%c2, %c0_12] : memref<8x128xf32, #tpu.memory_space<vmem>>, vector<1x16xf32>
    %29 = arith.truncf %26 : vector<16x16xf32> to vector<16x16xbf16>
    %cst_13 = arith.constant dense<0.000000e+00> : vector<16x32xf32>
    %30 = tpu.matmul %29, %27, %cst_13 {dimension_numbers = #tpu.dot_dimension_numbers<[1], [0], [0], [1], [0, 0, 1, 1], [], []>} : vector<16x16xbf16>, vector<16x32xbf16>, vector<16x32xf32> -> vector<16x32xf32>
    %31 = vector.extract_strided_slice %30 {offsets = [0, 0], sizes = [16, 16], strides = [1, 1]} : vector<16x32xf32> to vector<16x16xf32>
    %32 = arith.truncf %31 : vector<16x16xf32> to vector<16x16xbf16>
    %cst_14 = arith.constant dense<0.000000e+00> : vector<16x16xf32>
    %33 = tpu.matmul %0, %32, %cst_14 {dimension_numbers = #tpu.dot_dimension_numbers<[1], [0], [0], [1], [0, 0, 1, 1], [], []>} : vector<16x16xbf16>, vector<16x16xbf16>, vector<16x16xf32> -> vector<16x16xf32>
    %34 = vector.extract_strided_slice %30 {offsets = [0, 16], sizes = [16, 16], strides = [1, 1]} : vector<16x32xf32> to vector<16x16xf32>
    %35 = arith.addf %33, %34 : vector<16x16xf32>
    %36 = vector.broadcast %28 : vector<1x16xf32> to vector<16x16xf32>
    %37 = arith.addf %35, %36 : vector<16x16xf32>
    %38 = math.tanh %37 : vector<16x16xf32>
    %c40 = arith.constant 40 : index
    %c0_15 = arith.constant 0 : index
    %39 = vector.load %arg1[%c40, %c0_15] : memref<176x128xbf16, #tpu.memory_space<vmem>>, vector<16x64xbf16>
    %c3 = arith.constant 3 : index
    %c0_16 = arith.constant 0 : index
    %40 = vector.load %arg2[%c3, %c0_16] : memref<8x128xf32, #tpu.memory_space<vmem>>, vector<1x64xf32>
    %41 = arith.truncf %38 : vector<16x16xf32> to vector<16x16xbf16>
    %cst_17 = arith.constant dense<0.000000e+00> : vector<16x64xf32>
    %42 = tpu.matmul %41, %39, %cst_17 {dimension_numbers = #tpu.dot_dimension_numbers<[1], [0], [0], [1], [0, 0, 1, 1], [], []>} : vector<16x16xbf16>, vector<16x64xbf16>, vector<16x64xf32> -> vector<16x64xf32>
    %43 = vector.broadcast %40 : vector<1x64xf32> to vector<16x64xf32>
    %44 = arith.addf %42, %43 : vector<16x64xf32>
    %c56 = arith.constant 56 : index
    %c0_18 = arith.constant 0 : index
    %45 = vector.load %arg1[%c56, %c0_18] : memref<176x128xbf16, #tpu.memory_space<vmem>>, vector<64x32xbf16>
    %c4 = arith.constant 4 : index
    %c0_19 = arith.constant 0 : index
    %46 = vector.load %arg2[%c4, %c0_19] : memref<8x128xf32, #tpu.memory_space<vmem>>, vector<1x32xf32>
    %47 = arith.truncf %44 : vector<16x64xf32> to vector<16x64xbf16>
    %cst_20 = arith.constant dense<0.000000e+00> : vector<16x32xf32>
    %48 = tpu.matmul %47, %45, %cst_20 {dimension_numbers = #tpu.dot_dimension_numbers<[1], [0], [0], [1], [0, 0, 1, 1], [], []>} : vector<16x64xbf16>, vector<64x32xbf16>, vector<16x32xf32> -> vector<16x32xf32>
    %49 = vector.broadcast %46 : vector<1x32xf32> to vector<16x32xf32>
    %50 = arith.addf %48, %49 : vector<16x32xf32>
    %cst_21 = arith.constant 0.000000e+00 : f32
    %51 = vector.broadcast %cst_21 : f32 to vector<16x32xf32>
    %52 = arith.cmpf oge, %50, %51 : vector<16x32xf32>
    %cst_22 = arith.constant 0.00999999977 : f32
    %53 = vector.broadcast %cst_22 : f32 to vector<16x32xf32>
    %54 = arith.mulf %53, %50 : vector<16x32xf32>
    %55 = arith.select %52, %50, %54 : vector<16x32xi1>, vector<16x32xf32>
    %c120 = arith.constant 120 : index
    %c0_23 = arith.constant 0 : index
    %56 = vector.load %arg1[%c120, %c0_23] : memref<176x128xbf16, #tpu.memory_space<vmem>>, vector<32x32xbf16>
    %c5 = arith.constant 5 : index
    %c0_24 = arith.constant 0 : index
    %57 = vector.load %arg2[%c5, %c0_24] : memref<8x128xf32, #tpu.memory_space<vmem>>, vector<1x16xf32>
    %58 = arith.truncf %55 : vector<16x32xf32> to vector<16x32xbf16>
    %cst_25 = arith.constant dense<0.000000e+00> : vector<16x32xf32>
    %59 = tpu.matmul %58, %56, %cst_25 {dimension_numbers = #tpu.dot_dimension_numbers<[1], [0], [0], [1], [0, 0, 1, 1], [], []>} : vector<16x32xbf16>, vector<32x32xbf16>, vector<16x32xf32> -> vector<16x32xf32>
    %60 = vector.extract_strided_slice %59 {offsets = [0, 0], sizes = [16, 16], strides = [1, 1]} : vector<16x32xf32> to vector<16x16xf32>
    %61 = arith.truncf %60 : vector<16x16xf32> to vector<16x16xbf16>
    %cst_26 = arith.constant dense<0.000000e+00> : vector<16x16xf32>
    %62 = tpu.matmul %0, %61, %cst_26 {dimension_numbers = #tpu.dot_dimension_numbers<[1], [0], [0], [1], [0, 0, 1, 1], [], []>} : vector<16x16xbf16>, vector<16x16xbf16>, vector<16x16xf32> -> vector<16x16xf32>
    %63 = vector.extract_strided_slice %59 {offsets = [0, 16], sizes = [16, 16], strides = [1, 1]} : vector<16x32xf32> to vector<16x16xf32>
    %64 = arith.addf %62, %63 : vector<16x16xf32>
    %65 = vector.broadcast %57 : vector<1x16xf32> to vector<16x16xf32>
    %66 = arith.addf %64, %65 : vector<16x16xf32>
    %cst_27 = arith.constant 0.000000e+00 : f32
    %67 = vector.broadcast %cst_27 : f32 to vector<16x16xf32>
    %68 = arith.cmpf oge, %66, %67 : vector<16x16xf32>
    %cst_28 = arith.constant 0.00999999977 : f32
    %69 = vector.broadcast %cst_28 : f32 to vector<16x16xf32>
    %70 = arith.mulf %69, %66 : vector<16x16xf32>
    %71 = arith.select %68, %66, %70 : vector<16x16xi1>, vector<16x16xf32>
    %c152 = arith.constant 152 : index
    %c0_29 = arith.constant 0 : index
    %72 = vector.load %arg1[%c152, %c0_29] : memref<176x128xbf16, #tpu.memory_space<vmem>>, vector<16x16xbf16>
    %c6 = arith.constant 6 : index
    %c0_30 = arith.constant 0 : index
    %73 = vector.load %arg2[%c6, %c0_30] : memref<8x128xf32, #tpu.memory_space<vmem>>, vector<1x8xf32>
    %74 = arith.truncf %71 : vector<16x16xf32> to vector<16x16xbf16>
    %cst_31 = arith.constant dense<0.000000e+00> : vector<16x16xf32>
    %75 = tpu.matmul %74, %72, %cst_31 {dimension_numbers = #tpu.dot_dimension_numbers<[1], [0], [0], [1], [0, 0, 1, 1], [], []>} : vector<16x16xbf16>, vector<16x16xbf16>, vector<16x16xf32> -> vector<16x16xf32>
    %76 = vector.extract_strided_slice %75 {offsets = [0, 0], sizes = [16, 8], strides = [1, 1]} : vector<16x16xf32> to vector<16x8xf32>
    %77 = arith.truncf %76 : vector<16x8xf32> to vector<16x8xbf16>
    %cst_32 = arith.constant dense<0.000000e+00> : vector<16x8xf32>
    %78 = tpu.matmul %0, %77, %cst_32 {dimension_numbers = #tpu.dot_dimension_numbers<[1], [0], [0], [1], [0, 0, 1, 1], [], []>} : vector<16x16xbf16>, vector<16x8xbf16>, vector<16x8xf32> -> vector<16x8xf32>
    %79 = vector.extract_strided_slice %75 {offsets = [0, 8], sizes = [16, 8], strides = [1, 1]} : vector<16x16xf32> to vector<16x8xf32>
    %80 = arith.addf %78, %79 : vector<16x8xf32>
    %81 = vector.broadcast %73 : vector<1x8xf32> to vector<16x8xf32>
    %82 = arith.addf %80, %81 : vector<16x8xf32>
    %83 = math.tanh %82 : vector<16x8xf32>
    %c168 = arith.constant 168 : index
    %c0_33 = arith.constant 0 : index
    %84 = vector.load %arg1[%c168, %c0_33] : memref<176x128xbf16, #tpu.memory_space<vmem>>, vector<8x6xbf16>
    %c7 = arith.constant 7 : index
    %c0_34 = arith.constant 0 : index
    %85 = vector.load %arg2[%c7, %c0_34] : memref<8x128xf32, #tpu.memory_space<vmem>>, vector<1x3xf32>
    %86 = arith.truncf %83 : vector<16x8xf32> to vector<16x8xbf16>
    %cst_35 = arith.constant dense<0.000000e+00> : vector<16x6xf32>
    %87 = tpu.matmul %86, %84, %cst_35 {dimension_numbers = #tpu.dot_dimension_numbers<[1], [0], [0], [1], [0, 0, 1, 1], [], []>} : vector<16x8xbf16>, vector<8x6xbf16>, vector<16x6xf32> -> vector<16x6xf32>
    %88 = vector.extract_strided_slice %87 {offsets = [0, 0], sizes = [16, 3], strides = [1, 1]} : vector<16x6xf32> to vector<16x3xf32>
    %89 = arith.truncf %88 : vector<16x3xf32> to vector<16x3xbf16>
    %cst_36 = arith.constant dense<0.000000e+00> : vector<16x3xf32>
    %90 = tpu.matmul %0, %89, %cst_36 {dimension_numbers = #tpu.dot_dimension_numbers<[1], [0], [0], [1], [0, 0, 1, 1], [], []>} : vector<16x16xbf16>, vector<16x3xbf16>, vector<16x3xf32> -> vector<16x3xf32>
    %91 = vector.extract_strided_slice %87 {offsets = [0, 3], sizes = [16, 3], strides = [1, 1]} : vector<16x6xf32> to vector<16x3xf32>
    %92 = arith.addf %90, %91 : vector<16x3xf32>
    %93 = vector.broadcast %85 : vector<1x3xf32> to vector<16x3xf32>
    %94 = arith.addf %92, %93 : vector<16x3xf32>
    %cst_37 = arith.constant 0.000000e+00 : f32
    %95 = vector.broadcast %cst_37 : f32 to vector<16x61xf32>
    %96 = tpu.concatenate %44, %94, %95 in 1 : vector<16x64xf32>, vector<16x3xf32>, vector<16x61xf32> -> vector<16x128xf32>
    %c0_38 = arith.constant 0 : index
    %c0_39 = arith.constant 0 : index
    %97 = vector.load %arg3[%c0_38, %c0_39] : memref<16x128xf32, #tpu.memory_space<vmem>>, vector<16x128xf32>
    tpu.vector_store %arg3[%c0_38, %c0_39], %96 {strides = array<i32>} : memref<16x128xf32, #tpu.memory_space<vmem>>, vector<16x128xf32>,
    return
  }
}

</mosaic_0001>

<bundles_post_ra>
// kernel: gcn_message_forward.1
= control target key start
LH: loop header
LB: loop body
LE: loop exit
PB: predicated region body
PF: predicated region fallthrough
CT: control target
= control target key end

     0   :  { %vm30_vm0 = vcmask 1041408   ;;  %v1062_v1 = vmov 0.0   ;;  %vm1063_vm1 = vmmov 0   ;;  %s1064_s16 = smov 112   ;;  %vm26_vm2 = vcmask 31744   ;;  %s1065_s20 = smov 120   ;;  %s1242_s0 = inlined_call_operand.vmem [shape: bf16[16,128], index: 0, kind: input, shape index: {}]   ;;  %s1243_s1 = inlined_call_operand.vmem [shape: bf16[176,128], index: 1, kind: input, shape index: {}]   ;;  %s1244_s2 = inlined_call_operand.vmem [shape: f32[8,128], index: 2, kind: input, shape index: {}]   ;;  %s1245_s3 = inlined_call_operand.vmem [shape: f32[16,128], index: 3, kind: output, shape index: {}]  }
   0x1   :  { %v1091_v0 = vld [vmem:[%s1242_s0] sm:$0xff]   ;;  %937 = vmatprep.subr.bf16.mxu0 %v1062_v1  ;;  %939 = vmatprep.mubr.msk.bf16.mxu0 %vm1063_vm1, %v1062_v1  ;;  %vm84_vm3 = vcmask 130048   ;;  %v1037_v30 = vld [vmem:[%s1243_s1 + $0xc] sm:$0xff]   ;;  %v1038_v50 = vld [vmem:[%s1243_s1 + $0x14] sm:$0xff]   ;;  %vm457_vm4 = vcmask 523264   ;;  %vm526_vm7 = vcmask 261120  }
   0x2   :  { %v17_v2 = vld [vmem:[%s1243_s1] sm:$0x3]  ;;  %943 = vmatprep.subr.bf16.mxu1 %v1062_v1  ;;  %945 = vmatprep.mubr.msk.bf16.mxu1 %vm1063_vm1, %v1062_v1  ;;  %v1036_v10 = vld [vmem:[%s1243_s1 + $0x4] sm:$0xff]   ;;  %v883_v54 = vld [vmem:[%s1244_s2 + $0x2] ss:$0 sm:$0xff]  ;;  %vm752_vm10 = vcmask 1043456  }
   0x3   :  { %24 = vrot.lane.b32.xlu0 %v1091_v0, %s1064_s16  ;;  %v32_v3 = vsel %vm30_vm0, %v17_v2, 0  ;;  %v875_v12 = vld [vmem:[%s1244_s2] ss:$0 sm:$0xff]  ;;  %v879_v32 = vld [vmem:[%s1244_s2 + $0x1] ss:$0 sm:$0xff]  ;;  %v1040_v52 = vld [vmem:[%s1243_s1 + $0x24] sm:$0xff]  }
   0x4   :  { %938 = vmatpush3.bf16.msra.mxu0 %v32_v3  ;;  %v1039_v51 = vld [vmem:[%s1243_s1 + $0x1c] sm:$0xff]   ;;  %vm748_vm11 = vcmask 64512   ;;  %s1067_s27 = smov 64   ;;  %vm863_vm12 = vcmask 547840  }
   0x5   :  { %949 = vmatprep.subr.bf16.mxu0 %v1062_v1 }
  0x75   :  { %v25_v4 = vpop.permute.xlu0 %24 }
  0x76   :  { %940 = vmatmul.mubr.msk.bf16.vlgmr.msra.gmra.mrb[0].mxu0 %vm26_vm2, %v25_v4 }
  0x77   :  { %951 = vmatprep.mubr.msk.bf16.mxu0 %vm1063_vm1, %v1062_v1  ;;  %950 = vmatpush3.bf16.msra.mxu0 %v1036_v10 }
  0x78   :  { %961 = vmatprep.subr.bf16.mxu0 %v1062_v1 }
 0x149   :  { %v68_v5 = vpop.f32.mrb[0].mxu0 }
 0x14a   :  { %78 = vrot.lane.b32.xlu0 %v68_v5, %s1064_s16  ;;  %v941_v6 = vpop.f32.mrb[1].mxu0 }
 0x14b   :  { %v71_v7 = vpop.f32.mrb[2].mxu0  ;;  %v1042_v6 = vld [vmem:[%s1243_s1 + $0x34] sm:$0xff]  }
 0x14c   :  { %80 = vrot.lane.b32.xlu1 %v71_v7, %s1064_s16  ;;  %v942_v8 = vpop.f32.mrb[3].mxu0  ;;  %v75_v9 = vpack.c.bf16 %v71_v7, %v68_v5  ;;  %v1041_v5 = vld [vmem:[%s1243_s1 + $0x2c] sm:$0xff]   ;;  %v884_v7 = vld [vmem:[%s1244_s2 + $0x3] ss:$0 sm:$0xff] }
 0x14e   :  { %944 = vmatpush3.bf16.msra.mxu1 %v75_v9 }
 0x14f   :  { %955 = vmatprep.subr.bf16.mxu1 %v1062_v1 }
 0x151   :  { %946 = vmatmul.mubr.msk.bf16.vlgmr.msra.gmra.mrb[0].mxu1 %vm84_vm3, %v1091_v0 }
 0x152   :  { %957 = vmatprep.mubr.msk.bf16.mxu1 %vm1063_vm1, %v1062_v1 }
 0x1bc   :  { %v79_v11 = vpop.permute.xlu0 %78 }
 0x1be   :  { %v81_v16 = vpop.permute.xlu1 %80 }
 0x224   :  { %v122_v13 = vpop.f32.mrb[0].mxu1 }
 0x225   :  { %v123_v14 = vadd.f32 %v122_v13, %v79_v11  ;;  %v947_v15 = vpop.f32.mrb[1].mxu1 }
 0x226   :  { %v125_v17 = vpop.f32.mrb[2].mxu1  ;;  %v1043_v15 = vld [vmem:[%s1243_s1 + $0x3c] sm:$0xff]  }
 0x227   :  { %v133_v18 = vadd.f32 %v875_v12, %v123_v14  ;;  %v126_v19 = vadd.f32 %v125_v17, %v81_v16  ;;  %v948_v20 = vpop.f32.mrb[3].mxu1  ;;  %v1044_v16 = vld [vmem:[%s1243_s1 + $0x44] sm:$0xff]  }
 0x228   :  { %v887_v17 = vld [vmem:[%s1244_s2 + $0x4] ss:$0 sm:$0xff] }
 0x229   :  { %v134_v21 = vadd.f32 %v875_v12, %v126_v19  ;;  %1046 = vtanh.f32 %v133_v18 }
 0x22b   :  { %1048 = vtanh.f32 %v134_v21 }
 0x233   :  { %v1047_v22 = vpop.eup %1046 }
 0x235   :  { %v1049_v23 = vpop.eup %1048 }
 0x236   :  { %v140_v24 = vpack.c.bf16 %v1049_v23, %v1047_v22 }
 0x238   :  { %952 = vmatmul.mubr.msk.bf16.vlgmr.msra.gmra.mrb[4].mxu0 %vm84_vm3, %v140_v24 }
 0x239   :  { %963 = vmatprep.mubr.msk.bf16.mxu0 %vm1063_vm1, %v1062_v1  ;;  %962 = vmatpush3.bf16.msra.mxu0 %v1037_v30 }
 0x23a   :  { %973 = vmatprep.subr.bf16.mxu0 %v1062_v1 }
 0x30b   :  { %v184_v25 = vpop.f32.mrb[4].mxu0 }
 0x30c   :  { %194 = vrot.lane.b32.xlu1 %v184_v25, %s1064_s16  ;;  %v953_v26 = vpop.f32.mrb[5].mxu0 }
 0x30d   :  { %v187_v27 = vpop.f32.mrb[6].mxu0 }
 0x30e   :  { %v191_v28 = vpack.c.bf16 %v187_v27, %v184_v25  ;;  %196 = vrot.lane.b32.xlu0 %v187_v27, %s1064_s16  ;;  %v954_v29 = vpop.f32.mrb[7].mxu0 }
 0x310   :  { %956 = vmatpush3.bf16.msra.mxu1 %v191_v28 }
 0x311   :  { %967 = vmatprep.subr.bf16.mxu1 %v1062_v1 }
 0x313   :  { %958 = vmatmul.mubr.msk.bf16.vlgmr.msra.gmra.mrb[4].mxu1 %vm84_vm3, %v1091_v0 }
 0x314   :  { %969 = vmatprep.mubr.msk.bf16.mxu1 %vm1063_vm1, %v1062_v1 }
 0x37e   :  { %v195_v31 = vpop.permute.xlu1 %194 }
 0x380   :  { %v197_v36 = vpop.permute.xlu0 %196 }
 0x3e6   :  { %v234_v33 = vpop.f32.mrb[4].mxu1 }
 0x3e7   :  { %v235_v34 = vadd.f32 %v234_v33, %v195_v31  ;;  %v959_v35 = vpop.f32.mrb[5].mxu1 }
 0x3e8   :  { %v237_v37 = vpop.f32.mrb[6].mxu1 }
 0x3e9   :  { %v245_v38 = vadd.f32 %v879_v32, %v235_v34  ;;  %v238_v39 = vadd.f32 %v237_v37, %v197_v36  ;;  %v960_v40 = vpop.f32.mrb[7].mxu1  ;;  %v1045_v34 = vld [vmem:[%s1243_s1 + $0x4c] sm:$0xff]   ;;  %v897_v36 = vld [vmem:[%s1244_s2 + $0x5] ss:$0 sm:$0xff] }
 0x3eb   :  { %v246_v41 = vadd.f32 %v879_v32, %v238_v39  ;;  %1050 = vtanh.f32 %v245_v38 }
 0x3ed   :  { %1052 = vtanh.f32 %v246_v41 }
 0x3f5   :  { %v1051_v42 = vpop.eup %1050 }
 0x3f7   :  { %v1053_v43 = vpop.eup %1052 }
 0x3f8   :  { %v252_v44 = vpack.c.bf16 %v1053_v43, %v1051_v42 }
 0x3fa   :  { %964 = vmatmul.mubr.msk.bf16.vlgmr.msra.gmra.mrb[8].mxu0 %vm84_vm3, %v252_v44 }
 0x3fb   :  { %975 = vmatprep.mubr.msk.bf16.mxu0 %vm1063_vm1, %v1062_v1  ;;  %974 = vmatpush3.bf16.msra.mxu0 %v1038_v50 }
 0x3fc   :  { %991 = vmatprep.subr.bf16.mxu0 %v1062_v1 }
 0x4cd   :  { %v296_v45 = vpop.f32.mrb[8].mxu0 }
 0x4ce   :  { %306 = vrot.lane.b32.xlu1 %v296_v45, %s1064_s16  ;;  %v965_v46 = vpop.f32.mrb[9].mxu0 }
 0x4cf   :  { %v299_v47 = vpop.f32.mrb[10].mxu0 }
 0x4d0   :  { %v303_v48 = vpack.c.bf16 %v299_v47, %v296_v45  ;;  %308 = vrot.lane.b32.xlu0 %v299_v47, %s1064_s16  ;;  %v966_v49 = vpop.f32.mrb[11].mxu0 }
 0x4d2   :  { %968 = vmatpush3.bf16.msra.mxu1 %v303_v48 }
 0x4d3   :  { %979 = vmatprep.subr.bf16.mxu1 %v1062_v1 }
 0x4d5   :  { %970 = vmatmul.mubr.msk.bf16.vlgmr.msra.gmra.mrb[8].mxu1 %vm84_vm3, %v1091_v0 }
 0x4d6   :  { %987 = vmatprep.mubr.msk.bf16.mxu1 %vm1063_vm1, %v1062_v1  ;;  %980 = vmatpush3.bf16.msra.mxu1 %v1039_v51 }
 0x4d7   :  { %981 = vmatprep.subr.bf16.mxu1 %v1062_v1 }
 0x4da   :  { %982 = vmatpush3.bf16.msra.mxu1 %v1040_v52 }
 0x4db   :  { %983 = vmatprep.subr.bf16.mxu1 %v1062_v1 }
 0x4de   :  { %984 = vmatpush3.bf16.msra.mxu1 %v1041_v5 }
 0x4df   :  { %985 = vmatprep.subr.bf16.mxu1 %v1062_v1 }
 0x4e2   :  { %986 = vmatpush3.bf16.msra.mxu1 %v1042_v6 }
 0x4e3   :  { %1005 = vmatprep.subr.bf16.mxu1 %v1062_v1 }
 0x540   :  { %v307_v53 = vpop.permute.xlu1 %306 }
 0x542   :  { %v309_v58 = vpop.permute.xlu0 %308 }
 0x5a8   :  { %v346_v55 = vpop.f32.mrb[8].mxu1 }
 0x5a9   :  { %v347_v56 = vadd.f32 %v346_v55, %v307_v53  ;;  %v971_v57 = vpop.f32.mrb[9].mxu1 }
 0x5aa   :  { %v349_v59 = vpop.f32.mrb[10].mxu1 }
 0x5ab   :  { %v357_v60 = vadd.f32 %v883_v54, %v347_v56  ;;  %v350_v61 = vadd.f32 %v349_v59, %v309_v58  ;;  %v972_v62 = vpop.f32.mrb[11].mxu1  ;;  %v745_v56 = vld [vmem:[%s1243_s1 + $0x54] sm:$0xf]  ;;  %v901_v59 = vld [vmem:[%s1244_s2 + $0x6] ss:$0 sm:$0xff]  ;;  %s1066_s1 = smov 125  }
 0x5ac   :  { %v754_v57 = vsel %vm752_vm10, %v745_v56, 0 }
 0x5ad   :  { %v358_v63 = vadd.f32 %v883_v54, %v350_v61  ;;  %1054 = vtanh.f32 %v357_v60 }
 0x5af   :  { %1056 = vtanh.f32 %v358_v63 }
 0x5b7   :  { %v1055_v2 = vpop.eup %1054 }
 0x5b9   :  { %v1057_v3 = vpop.eup %1056 }
 0x5ba   :  { %v364_v4 = vpack.c.bf16 %v1057_v3, %v1055_v2 }
 0x5bc   :  { %976 = vmatmul.mubr.msk.bf16.vlgmr.msra.gmra.mrb[12].mxu0 %vm84_vm3, %v364_v4 }
 0x5bd   :  { %995 = vmatprep.mubr.msk.bf16.mxu0 %vm1063_vm1, %v1062_v1  ;;  %992 = vmatpush3.bf16.msra.mxu0 %v1043_v15 }
 0x5be   :  { %993 = vmatprep.subr.bf16.mxu0 %v1062_v1 }
 0x5c1   :  { %994 = vmatpush3.bf16.msra.mxu0 %v1044_v16 }
 0x5c2   :  { %999 = vmatprep.subr.bf16.mxu0 %v1062_v1 }
 0x68f   :  { %v412_v8 = vpop.f32.mrb[12].mxu0 }
 0x690   :  { %v977_v9 = vpop.f32.mrb[13].mxu0  ;;  %v1177_v11 = vadd.f32 %v884_v7, %v412_v8 }
 0x691   :  { %v415_v10 = vpop.f32.mrb[14].mxu0 }
 0x692   :  { %v1179_v12 = vadd.f32 %v884_v7, %v415_v10  ;;  %v978_v13 = vpop.f32.mrb[15].mxu0 }
 0x694   :  { %v428_v14 = vpack.c.bf16 %v1179_v12, %v1177_v11 }
 0x696   :  { %988 = vmatmul.mubr.msk.bf16.vlgmr.msra.gmra.mrb[12].mxu1 %vm457_vm4, %v428_v14 }
 0x697   :  { %1007 = vmatprep.mubr.msk.bf16.mxu1 %vm1063_vm1, %v1062_v1  ;;  %1006 = vmatpush3.bf16.msra.mxu1 %v1045_v34 }
 0x698   :  { %1017 = vmatprep.subr.bf16.mxu1 %v1062_v1 }
 0x769   :  { %v495_v18 = vpop.f32.mrb[12].mxu1 }
 0x76a   :  { %v496_v19 = vadd.f32 %v887_v17, %v495_v18  ;;  %v989_v20 = vpop.f32.mrb[13].mxu1 }
 0x76b   :  { %v498_v21 = vpop.f32.mrb[14].mxu1 }
 0x76c   :  { %v504_v22 = vmul.f32 0.01, %v496_v19  ;;  %v499_v23 = vadd.f32 %v887_v17, %v498_v21  ;;  %v990_v24 = vpop.f32.mrb[15].mxu1  ;;  %vm502_vm5 = vcmp.ge.f32.partialorder %v496_v19, 0.0  ;;  %v904_v17 = vld [vmem:[%s1244_s2 + $0x7] ss:$0 sm:$0xff] }
 0x76e   :  { %vm503_vm6 = vcmp.ge.f32.partialorder %v499_v23, 0.0  ;;  %v505_v25 = vmul.f32 0.01, %v499_v23  ;;  %v506_v26 = vsel %vm502_vm5, %v496_v19, %v504_v22 }
 0x770   :  { %v507_v27 = vsel %vm503_vm6, %v499_v23, %v505_v25 }
 0x771   :  { %v513_v28 = vpack.c.bf16 %v507_v27, %v506_v26 }
 0x773   :  { %996 = vmatmul.mubr.msk.bf16.vlgmr.msra.gmra.mrb[16].mxu0 %vm526_vm7, %v513_v28 }
 0x774   :  { %1001 = vmatprep.mubr.msk.bf16.mxu0 %vm1063_vm1, %v1062_v1 }
 0x846   :  { %v564_v29 = vpop.f32.mrb[16].mxu0 }
 0x847   :  { %574 = vrot.lane.b32.xlu1 %v564_v29, %s1064_s16  ;;  %v997_v30 = vpop.f32.mrb[17].mxu0 }
 0x848   :  { %v567_v31 = vpop.f32.mrb[18].mxu0 }
 0x849   :  { %v571_v32 = vpack.c.bf16 %v567_v31, %v564_v29  ;;  %576 = vrot.lane.b32.xlu0 %v567_v31, %s1064_s16  ;;  %v998_v33 = vpop.f32.mrb[19].mxu0 }
 0x84b   :  { %1000 = vmatpush3.bf16.msra.mxu0 %v571_v32 }
 0x84c   :  { %1011 = vmatprep.subr.bf16.mxu0 %v1062_v1 }
 0x84e   :  { %1002 = vmatmul.mubr.msk.bf16.vlgmr.msra.gmra.mrb[20].mxu0 %vm84_vm3, %v1091_v0 }
 0x84f   :  { %1013 = vmatprep.mubr.msk.bf16.mxu0 %vm1063_vm1, %v1062_v1 }
 0x8b9   :  { %v575_v35 = vpop.permute.xlu1 %574 }
 0x8bb   :  { %v577_v40 = vpop.permute.xlu0 %576 }
 0x921   :  { %v614_v37 = vpop.f32.mrb[20].mxu0 }
 0x922   :  { %v615_v38 = vadd.f32 %v614_v37, %v575_v35  ;;  %v1003_v39 = vpop.f32.mrb[21].mxu0 }
 0x923   :  { %v617_v41 = vpop.f32.mrb[22].mxu0 }
 0x924   :  { %v625_v42 = vadd.f32 %v897_v36, %v615_v38  ;;  %v618_v43 = vadd.f32 %v617_v41, %v577_v40  ;;  %v1004_v44 = vpop.f32.mrb[23].mxu0 }
 0x926   :  { %v629_v45 = vmul.f32 0.01, %v625_v42  ;;  %v626_v46 = vadd.f32 %v897_v36, %v618_v43  ;;  %vm627_vm8 = vcmp.ge.f32.partialorder %v625_v42, 0.0 }
 0x928   :  { %vm628_vm9 = vcmp.ge.f32.partialorder %v626_v46, 0.0  ;;  %v630_v47 = vmul.f32 0.01, %v626_v46  ;;  %v631_v48 = vsel %vm627_vm8, %v625_v42, %v629_v45 }
 0x92a   :  { %v632_v49 = vsel %vm628_vm9, %v626_v46, %v630_v47 }
 0x92b   :  { %v636_v50 = vpack.c.bf16 %v632_v49, %v631_v48 }
 0x92d   :  { %1008 = vmatmul.mubr.msk.bf16.vlgmr.msra.gmra.mrb[16].mxu1 %vm84_vm3, %v636_v50 }
 0x92e   :  { %1019 = vmatprep.mubr.msk.bf16.mxu1 %vm1063_vm1, %v1062_v1  ;;  %1018 = vmatpush3.bf16.msra.mxu1 %v754_v57 }
 0xa00   :  { %v680_v51 = vpop.f32.mrb[16].mxu1 }
 0xa01   :  { %690 = vrot.lane.b32.xlu1 %v680_v51, %s1065_s20  ;;  %v1009_v52 = vpop.f32.mrb[17].mxu1 }
 0xa02   :  { %v683_v53 = vpop.f32.mrb[18].mxu1 }
 0xa03   :  { %v687_v54 = vpack.c.bf16 %v683_v53, %v680_v51  ;;  %692 = vrot.lane.b32.xlu0 %v683_v53, %s1065_s20  ;;  %v1010_v55 = vpop.f32.mrb[19].mxu1 }
 0xa05   :  { %1012 = vmatpush3.bf16.msra.mxu0 %v687_v54 }
 0xa06   :  { %1023 = vmatprep.subr.bf16.mxu0 %v1062_v1 }
 0xa08   :  { %1014 = vmatmul.mubr.msk.bf16.vlgmr.msra.gmra.mrb[24].mxu0 %vm84_vm3, %v1091_v0 }
 0xa09   :  { %1025 = vmatprep.mubr.msk.bf16.mxu0 %vm1063_vm1, %v1062_v1 }
 0xa73   :  { %v691_v58 = vpop.permute.xlu1 %690 }
 0xa75   :  { %v693_v63 = vpop.permute.xlu0 %692 }
 0xadb   :  { %v730_v60 = vpop.f32.mrb[24].mxu0 }
 0xadc   :  { %v731_v61 = vadd.f32 %v730_v60, %v691_v58  ;;  %v1015_v62 = vpop.f32.mrb[25].mxu0 }
 0xadd   :  { %v733_v2 = vpop.f32.mrb[26].mxu0 }
 0xade   :  { %v741_v3 = vadd.f32 %v901_v59, %v731_v61  ;;  %v734_v4 = vadd.f32 %v733_v2, %v693_v63  ;;  %v1016_v1 = vpop.f32.mrb[27].mxu0 }
 0xae0   :  { %v742_v5 = vadd.f32 %v901_v59, %v734_v4  ;;  %1058 = vtanh.f32 %v741_v3 }
 0xae2   :  { %1060 = vtanh.f32 %v742_v5 }
 0xaea   :  { %v1059_v6 = vpop.eup %1058 }
 0xaec   :  { %v1061_v7 = vpop.eup %1060 }
 0xaed   :  { %v747_v8 = vpack.c.bf16 %v1061_v7, %v1059_v6 }
 0xaef   :  { %1020 = vmatmul.mubr.msk.bf16.vlgmr.msra.gmra.mrb[20].mxu1 %vm748_vm11, %v747_v8 }
 0xbc2   :  { %v790_v9 = vpop.f32.mrb[20].mxu1 }
 0xbc3   :  { %800 = vrot.lane.b32.xlu1 %v790_v9, %s1066_s1  ;;  %v1021_v10 = vpop.f32.mrb[21].mxu1 }
 0xbc4   :  { %v793_v13 = vpop.f32.mrb[22].mxu1 }
 0xbc5   :  { %v797_v14 = vpack.c.bf16 %v793_v13, %v790_v9  ;;  %802 = vrot.lane.b32.xlu0 %v793_v13, %s1066_s1  ;;  %v1022_v15 = vpop.f32.mrb[23].mxu1 }
 0xbc7   :  { %1024 = vmatpush3.bf16.msra.mxu0 %v797_v14 }
 0xbca   :  { %1026 = vmatmul.mubr.msk.bf16.vlgmr.msra.gmra.mrb[28].mxu0 %vm84_vm3, %v1091_v0 }
 0xc35   :  { %v801_v16 = vpop.permute.xlu1 %800 }
 0xc37   :  { %v803_v21 = vpop.permute.xlu0 %802 }
 0xc9d   :  { %v840_v18 = vpop.f32.mrb[28].mxu0 }
 0xc9e   :  { %v841_v19 = vadd.f32 %v840_v18, %v801_v16  ;;  %v1027_v20 = vpop.f32.mrb[29].mxu0 }
 0xc9f   :  { %v843_v22 = vpop.f32.mrb[30].mxu0 }
 0xca0   :  { %v851_v23 = vadd.f32 %v904_v17, %v841_v19  ;;  %v844_v24 = vadd.f32 %v843_v22, %v803_v21  ;;  %v1028_v25 = vpop.f32.mrb[31].mxu0 }
 0xca2   :  { %v852_v26 = vadd.f32 %v904_v17, %v844_v24  ;;  %855 = vrot.lane.b32.xlu1 %v851_v23, %s1067_s27 }
 0xca4   :  { %857 = vrot.lane.b32.xlu0 %v852_v26, %s1067_s27 }
 0xd14   :  { %v856_v27 = vpop.permute.xlu1 %855 }
 0xd15   :  { %v861_v0 = vsel %vm457_vm4, %v1177_v11, %v856_v27 }
 0xd16   :  { %v864_v28 = vsel %vm863_vm12, %v861_v0, 0.0  ;;  %v858_v29 = vpop.permute.xlu0 %857 }
 0xd17   :  { %866 = vst [vmem:[%s1245_s3] sm:$0xff] %v864_v28  ;;  %v862_v30 = vsel %vm457_vm4, %v1179_v12, %v858_v29 }
 0xd18   :  { %v865_v31 = vsel %vm863_vm12, %v862_v30, 0.0 }
 0xd19   :  { %867 = vst [vmem:[%s1245_s3 + $0x8] sm:$0xff] %v865_v31 }

</bundles_post_ra>
